<compile_context>
chip_gen: v5e
topology: v5e:2x2
jax: 0.10.0
libtpu: 0.0.40
codegen_flags: <defaults>
</compile_context>

<pallas_src>
import functools
import math

import jax
import jax.numpy as jnp
from jax.experimental import pallas as pl
from jax.experimental.pallas import tpu as pltpu


_BN_EPS = 1e-5
_INV_SQRT2 = 1.0 / math.sqrt(2.0)


# --------------------------------------------------------------------------------------
# Planning helpers (pure Python on static shapes)
# --------------------------------------------------------------------------------------

def _round_up(v, m):
    return ((v + m - 1) // m) * m


def _vmem_capacity_bytes():
    """Generation-aware VMEM capacity (v5e/v6e: 128 MiB, v7x: 64 MiB); safe fallback."""
    try:
        info = pltpu.get_tpu_info()
        cap = getattr(info, "vmem_capacity_bytes", None)
        if cap:
            return int(cap)
    except Exception:
        pass
    return 128 * 1024 * 1024


def _invariant_spec(block_shape, index_map):
    """BlockSpec for a grid-invariant operand: single-buffered (no wasted double buffer)."""
    try:
        return pl.BlockSpec(block_shape, index_map, pipeline_mode=pl.Buffered(1))
    except Exception:  # older BlockSpec signature without pipeline_mode
        return pl.BlockSpec(block_shape, index_map)


def _plan_fused(n, in_f, hidden, out_f, budget):
    """Whole batch resident, grid over hidden tiles only.  Hidden padded to the tile."""
    n_pad = _round_up(max(n, 1), 8)
    k_pad = _round_up(in_f, 128)
    o_pad = _round_up(out_f, 128)
    h_cap = _round_up(hidden, 128)
    plan = None
    for cand in (1024, 512, 256, 128):
        th = min(cand, h_cap)
        h_pad = _round_up(hidden, th)          # tile-aligned: never forces a th=128 fallback
        need = (n_pad * k_pad * 2              # x (bf16, single-buffered, resident)
                + n_pad * o_pad * 4            # resident f32 output block (accumulator)
                + 2 * th * (k_pad + o_pad) * 2 # double-buffered W1^T / W2^T tiles (bf16)
                + 2 * 3 * th * 4               # b1 / gamma / beta row tiles
                + 2 * o_pad * 4)               # b2 row
        plan = dict(n_pad=n_pad, k_pad=k_pad, o_pad=o_pad, h_pad=h_pad, th=th,
                    fits=(need <= budget))
        if plan["fits"]:
            return plan
    return plan


def _plan_two_pass(n, in_f, hidden, out_f, budget):
    """Batch-tiled two-pass plan (exact BN stats via a separate reduction pass)."""
    k_pad = _round_up(in_f, 128)
    o_pad = _round_up(out_f, 128)
    h_cap = _round_up(hidden, 128)
    n8 = _round_up(max(n, 1), 8)
    fallback = None
    for tb_c in (256, 128, 64, 32, 16, 8):
        tb = min(tb_c, n8)
        for th_c in (512, 256, 128):
            th = min(th_c, h_cap)
            h_pad = _round_up(hidden, th)
            need1 = (2 * tb * k_pad * 2 + 2 * k_pad * th * 2     # x tile + W1^T tile
                     + 2 * tb * th * 4 + 6 * th * 4)             # h out + b1/sums rows
            need2 = (2 * tb * th * 4 + 2 * th * o_pad * 2        # h tile + W2^T tile
                     + tb * o_pad * 4 + 4 * th * 4 + 2 * o_pad * 4)
            plan = dict(tb=tb, th=th, h_pad=h_pad, k_pad=k_pad, o_pad=o_pad,
                        n_pad=_round_up(max(n, 1), tb))
            if max(need1, need2) <= budget:
                return plan
            if fallback is None:
                fallback = plan
    return fallback


# --------------------------------------------------------------------------------------
# Kernels
# --------------------------------------------------------------------------------------

def _fused_kernel(n_valid, inv_n, needs_mask,
                  x_ref, w1t_ref, b1_ref, gamma_ref, beta_ref, w2t_ref, b2_ref, o_ref):
    """Single pass, whole batch resident.  Grid axis 0 tiles hidden (fc2 reduction)."""
    h_idx = pl.program_id(0)

    # fc1 tile: (n_pad, k_pad) @ (k_pad, th) -- plain row-major contraction on the MXU.
    h = jnp.dot(x_ref[...], w1t_ref[...], preferred_element_type=jnp.float32) + b1_ref[...]

    # BatchNorm1d training-mode batch statistics (biased variance) over the valid rows.
    if needs_mask:
        rid = jax.lax.broadcasted_iota(jnp.int32, (h.shape[0], 1), 0)
        mask = (rid < n_valid).astype(jnp.float32)
        mean = jnp.sum(h * mask, axis=0, keepdims=True) * inv_n
        diff = h - mean
        var = jnp.sum(diff * diff * mask, axis=0, keepdims=True) * inv_n
    else:
        mean = jnp.sum(h, axis=0, keepdims=True) * inv_n
        diff = h - mean
        var = jnp.sum(diff * diff, axis=0, keepdims=True) * inv_n

    scale = jax.lax.rsqrt(var + _BN_EPS) * gamma_ref[...]       # folded (1, th) BN scale
    h_bn = diff * scale + beta_ref[...]

    # Exact (erf) GELU -- nn.GELU() default.  Dropout(p=0.0) is identity.
    a = 0.5 * h_bn * (1.0 + jax.lax.erf(h_bn * _INV_SQRT2))

    partial = jnp.dot(a.astype(jnp.bfloat16), w2t_ref[...],
                      preferred_element_type=jnp.float32)

    # Accumulate fc2 partials directly into the resident output block (no scratch).
    @pl.when(h_idx == 0)
    def _():
        o_ref[...] = jnp.broadcast_to(b2_ref[...], o_ref.shape)

    o_ref[...] += partial


def _fc1_stats_kernel(n_valid, x_ref, w1t_ref, b1_ref, h_ref, sum_ref, sq_ref):
    """Two-pass pass 1: fc1 + per-hidden-feature sum / sum-of-squares over the batch.

    Grid = (hidden tiles ["parallel"], batch tiles ["arbitrary"/reduction]).
    """
    b_idx = pl.program_id(1)
    tb = x_ref.shape[0]

    h = jnp.dot(x_ref[...], w1t_ref[...], preferred_element_type=jnp.float32) + b1_ref[...]
    h_ref[...] = h

    rid = jax.lax.broadcasted_iota(jnp.int32, (tb, 1), 0) + b_idx * tb
    mask = (rid < n_valid).astype(jnp.float32)
    hm = h * mask

    @pl.when(b_idx == 0)
    def _():
        sum_ref[...] = jnp.zeros_like(sum_ref)
        sq_ref[...] = jnp.zeros_like(sq_ref)

    sum_ref[...] += jnp.sum(hm, axis=0, keepdims=True)
    sq_ref[...] += jnp.sum(hm * h, axis=0, keepdims=True)


def _bn_gelu_fc2_kernel(h_ref, scale_ref, shift_ref, w2t_ref, b2_ref, o_ref):
    """Two-pass pass 2: BN apply + GELU + fc2.

    Grid = (batch tiles ["parallel"], hidden tiles ["arbitrary"/fc2 reduction]).
    """
    h_idx = pl.program_id(1)

    h_bn = h_ref[...] * scale_ref[...] + shift_ref[...]
    a = 0.5 * h_bn * (1.0 + jax.lax.erf(h_bn * _INV_SQRT2))
    partial = jnp.dot(a.astype(jnp.bfloat16), w2t_ref[...],
                      preferred_element_type=jnp.float32)

    @pl.when(h_idx == 0)
    def _():
        o_ref[...] = jnp.broadcast_to(b2_ref[...], o_ref.shape)

    o_ref[...] += partial


# --------------------------------------------------------------------------------------
# Wrappers
# --------------------------------------------------------------------------------------

def _pad_params(x, w1, b1, gamma, beta, w2, b2, n_pad, k_pad, h_pad, o_pad):
    n, in_f = x.shape
    hidden = w1.shape[0]
    out_f = w2.shape[0]
    # Zero padding is inert: padded hidden/out columns have zero weights/gamma/beta, padded
    # batch rows are masked out of the BN statistics and sliced off the output.
    x_b = jnp.pad(x, ((0, n_pad - n), (0, k_pad - in_f))).astype(jnp.bfloat16)
    # Pre-transpose in the wrapper (fuses into the pad + bf16 cast) -> row-major contractions.
    w1t = jnp.pad(w1, ((0, h_pad - hidden), (0, k_pad - in_f))).T.astype(jnp.bfloat16)
    w2t = jnp.pad(w2, ((0, o_pad - out_f), (0, h_pad - hidden))).T.astype(jnp.bfloat16)
    b1_p = jnp.pad(b1, (0, h_pad - hidden)).reshape(1, h_pad).astype(jnp.float32)
    gamma_p = jnp.pad(gamma, (0, h_pad - hidden)).reshape(1, h_pad).astype(jnp.float32)
    beta_p = jnp.pad(beta, (0, h_pad - hidden)).reshape(1, h_pad).astype(jnp.float32)
    b2_p = jnp.pad(b2, (0, o_pad - out_f)).reshape(1, o_pad).astype(jnp.float32)
    return x_b, w1t, b1_p, gamma_p, beta_p, w2t, b2_p


def _mlp_fused(x, w1, b1, gamma, beta, w2, b2, plan, vmem_limit):
    n, _ = x.shape
    out_f = w2.shape[0]
    n_pad, k_pad, h_pad, o_pad, th = (plan[k] for k in ("n_pad", "k_pad", "h_pad", "o_pad", "th"))
    n_tiles = h_pad // th

    x_b, w1t, b1_p, gamma_p, beta_p, w2t, b2_p = _pad_params(
        x, w1, b1, gamma, beta, w2, b2, n_pad, k_pad, h_pad, o_pad)

    needs_mask = (n != n_pad)
    kernel = functools.partial(_fused_kernel, n, 1.0 / n, needs_mask)

    cost = pl.CostEstimate(
        flops=2 * n_pad * h_pad * (k_pad + o_pad),
        transcendentals=n_pad * h_pad,                      # erf in GELU
        bytes_accessed=(x_b.size + w1t.size + w2t.size) * 2
        + (b1_p.size + gamma_p.size + beta_p.size + b2_p.size) * 4
        + n_pad * o_pad * 4,
    )

    out = pl.pallas_call(
        kernel,
        out_shape=jax.ShapeDtypeStruct((n_pad, o_pad), jnp.float32),
        grid_spec=pltpu.PrefetchScalarGridSpec(
            num_scalar_prefetch=0,
            grid=(n_tiles,),
            in_specs=[
                _invariant_spec((n_pad, k_pad), lambda h: (0, 0)),   # x (grid-invariant)
                pl.BlockSpec((k_pad, th), lambda h: (0, h)),         # W1^T tile
                pl.BlockSpec((1, th), lambda h: (0, h)),             # b1 tile
                pl.BlockSpec((1, th), lambda h: (0, h)),             # gamma tile
                pl.BlockSpec((1, th), lambda h: (0, h)),             # beta tile
                pl.BlockSpec((th, o_pad), lambda h: (h, 0)),         # W2^T tile (contiguous rows)
                _invariant_spec((1, o_pad), lambda h: (0, 0)),       # b2 (grid-invariant)
            ],
            out_specs=pl.BlockSpec((n_pad, o_pad), lambda h: (0, 0)),
        ),
        compiler_params=pltpu.CompilerParams(
            # Hidden axis is the fc2 reduction -> "arbitrary".  Large-batch shapes take the
            # two-pass path below which exposes a "parallel" batch axis for v7x's 2 TCs.
            dimension_semantics=("arbitrary",),
            vmem_limit_bytes=vmem_limit,
        ),
        cost_estimate=cost,
    )(x_b, w1t, b1_p, gamma_p, beta_p, w2t, b2_p)

    return out[:n, :out_f]


def _mlp_two_pass(x, w1, b1, gamma, beta, w2, b2, plan, vmem_limit):
    n, _ = x.shape
    out_f = w2.shape[0]
    n_pad, k_pad, h_pad, o_pad, tb, th = (
        plan[k] for k in ("n_pad", "k_pad", "h_pad", "o_pad", "tb", "th"))
    nb = n_pad // tb
    nh = h_pad // th

    x_b, w1t, b1_p, gamma_p, beta_p, w2t, b2_p = _pad_params(
        x, w1, b1, gamma, beta, w2, b2, n_pad, k_pad, h_pad, o_pad)

    # ---- Pass 1: fc1 + exact batch statistics (hidden "parallel", batch reduction). ----
    cost1 = pl.CostEstimate(
        flops=2 * n_pad * k_pad * h_pad,
        transcendentals=0,
        bytes_accessed=x_b.size * 2 * nh + w1t.size * 2 + b1_p.size * 4
        + n_pad * h_pad * 4 + 2 * h_pad * 4,
    )
    h_f32, h_sum, h_sq = pl.pallas_call(
        functools.partial(_fc1_stats_kernel, n),
        out_shape=(jax.ShapeDtypeStruct((n_pad, h_pad), jnp.float32),
                   jax.ShapeDtypeStruct((1, h_pad), jnp.float32),
                   jax.ShapeDtypeStruct((1, h_pad), jnp.float32)),
        grid_spec=pltpu.PrefetchScalarGridSpec(
            num_scalar_prefetch=0,
            grid=(nh, nb),
            in_specs=[
                pl.BlockSpec((tb, k_pad), lambda hi, bi: (bi, 0)),   # x batch tile
                pl.BlockSpec((k_pad, th), lambda hi, bi: (0, hi)),   # W1^T tile
                pl.BlockSpec((1, th), lambda hi, bi: (0, hi)),       # b1 tile
            ],
            out_specs=(
                pl.BlockSpec((tb, th), lambda hi, bi: (bi, hi)),     # h spill (f32, exact BN)
                pl.BlockSpec((1, th), lambda hi, bi: (0, hi)),       # sum   (resident over batch)
                pl.BlockSpec((1, th), lambda hi, bi: (0, hi)),       # sumsq (resident over batch)
            ),
        ),
        compiler_params=pltpu.CompilerParams(
            dimension_semantics=("parallel", "arbitrary"),
            vmem_limit_bytes=vmem_limit,
        ),
        cost_estimate=cost1,
    )(x_b, w1t, b1_p)

    # Tiny (1, h_pad) math between the passes: fold BN into one scale/shift pair.
    inv_n = 1.0 / n
    mean = h_sum * inv_n
    var = jnp.maximum(h_sq * inv_n - mean * mean, 0.0)          # biased variance
    scale = gamma_p * jax.lax.rsqrt(var + _BN_EPS)              # padded cols: gamma=0 -> 0
    shift = beta_p - mean * scale

    # ---- Pass 2: BN apply + GELU + fc2 (batch "parallel", hidden reduction). ----
    cost2 = pl.CostEstimate(
        flops=2 * n_pad * h_pad * o_pad,
        transcendentals=n_pad * h_pad,
        bytes_accessed=n_pad * h_pad * 4 + w2t.size * 2 * nb
        + 2 * h_pad * 4 + b2_p.size * 4 + n_pad * o_pad * 4,
    )
    out = pl.pallas_call(
        _bn_gelu_fc2_kernel,
        out_shape=jax.ShapeDtypeStruct((n_pad, o_pad), jnp.float32),
        grid_spec=pltpu.PrefetchScalarGridSpec(
            num_scalar_prefetch=0,
            grid=(nb, nh),
            in_specs=[
                pl.BlockSpec((tb, th), lambda bi, hi: (bi, hi)),     # h tile
                pl.BlockSpec((1, th), lambda bi, hi: (0, hi)),       # BN scale
                pl.BlockSpec((1, th), lambda bi, hi: (0, hi)),       # BN shift
                pl.BlockSpec((th, o_pad), lambda bi, hi: (hi, 0)),   # W2^T tile
                _invariant_spec((1, o_pad), lambda bi, hi: (0, 0)),  # b2 (grid-invariant)
            ],
            out_specs=pl.BlockSpec((tb, o_pad), lambda bi, hi: (bi, 0)),
        ),
        compiler_params=pltpu.CompilerParams(
            dimension_semantics=("parallel", "arbitrary"),
            vmem_limit_bytes=vmem_limit,
        ),
        cost_estimate=cost2,
    )(h_f32, scale, shift, w2t, b2_p)

    return out[:n, :out_f]


@functools.partial(jax.jit, static_argnames=("impl",))
def mlp_forward(x, w1, b1, gamma, beta, w2, b2, impl="auto"):
    """x: (N, in); w1: (hidden, in); w2: (out, hidden) -- PyTorch layouts, f32 params."""
    n, in_f = x.shape
    hidden = w1.shape[0]
    out_f = w2.shape[0]

    cap = _vmem_capacity_bytes()
    budget = int(cap * 0.70)
    vmem_limit = min(int(cap * 0.86), 96 * 1024 * 1024)

    if impl == "fused":
        return _mlp_fused(x, w1, b1, gamma, beta, w2, b2,
                          _plan_fused(n, in_f, hidden, out_f, budget), vmem_limit)
    if impl == "two_pass":
        return _mlp_two_pass(x, w1, b1, gamma, beta, w2, b2,
                             _plan_two_pass(n, in_f, hidden, out_f, budget), vmem_limit)

    # auto: fused single pass while the whole batch fits the VMEM budget, otherwise the
    # batch-tiled two-pass path (bounded VMEM + a "parallel" batch axis for v7x).
    plan = _plan_fused(n, in_f, hidden, out_f, budget)
    if plan["fits"]:
        return _mlp_fused(x, w1, b1, gamma, beta, w2, b2, plan, vmem_limit)
    return _mlp_two_pass(x, w1, b1, gamma, beta, w2, b2,
                         _plan_two_pass(n, in_f, hidden, out_f, budget), vmem_limit)


# --------------------------------------------------------------------------------------
# Parameters / reference / test
# --------------------------------------------------------------------------------------

def init_params(key, in_features, hidden_features, out_features):
    """PyTorch-style defaults: Linear uniform +-1/sqrt(fan_in); BN gamma=1, beta=0."""
    k1, k2, k3, k4 = jax.random.split(key, 4)
    bound1 = 1.0 / math.sqrt(in_features)
    bound2 = 1.0 / math.sqrt(hidden_features)
    w1 = jax.random.uniform(k1, (hidden_features, in_features), jnp.float32, -bound1, bound1)
    b1 = jax.random.uniform(k2, (hidden_features,), jnp.float32, -bound1, bound1)
    w2 = jax.random.uniform(k3, (out_features, hidden_features), jnp.float32, -bound2, bound2)
    b2 = jax.random.uniform(k4, (out_features,), jnp.float32, -bound2, bound2)
    gamma = jnp.ones((hidden_features,), jnp.float32)
    beta = jnp.zeros((hidden_features,), jnp.float32)
    return w1, b1, gamma, beta, w2, b2


def _reference(x, w1, b1, gamma, beta, w2, b2):
    """Pure-JAX reference with matching bf16 matmul inputs / f32 accumulation."""
    h = jnp.dot(x.astype(jnp.bfloat16), w1.astype(jnp.bfloat16).T,
                preferred_element_type=jnp.float32) + b1
    mean = h.mean(axis=0, keepdims=True)
    var = ((h - mean) ** 2).mean(axis=0, keepdims=True)
    h = (h - mean) * jax.lax.rsqrt(var + _BN_EPS) * gamma + beta
    a = 0.5 * h * (1.0 + jax.lax.erf(h * _INV_SQRT2))
    return jnp.dot(a.astype(jnp.bfloat16), w2.astype(jnp.bfloat16).T,
                   preferred_element_type=jnp.float32) + b2


if __name__ == "__main__":
    in_features, hidden_features, out_features = 16, 32, 16

    key = jax.random.PRNGKey(0)
    kx, kp = jax.random.split(key)
    w1, b1, gamma, beta, w2, b2 = init_params(kp, in_features, hidden_features, out_features)

    # Exercise: fused path, forced two-pass path, and the masked (non-multiple-of-8) batch.
    for batch, impl in ((8, "auto"), (8, "two_pass"), (6, "auto"), (6, "two_pass")):
        xb = jax.random.normal(jax.random.fold_in(kx, batch),
                               (batch, in_features), dtype=jnp.float32)
        y = jax.block_until_ready(mlp_forward(xb, w1, b1, gamma, beta, w2, b2, impl=impl))
        y_ref = _reference(xb, w1, b1, gamma, beta, w2, b2)
        assert y.shape == (batch, out_features)
        assert jnp.allclose(y, y_ref, atol=1e-2, rtol=1e-2), \
            f"mismatch vs JAX reference (impl={impl}, batch={batch})"

    print("KERNEL_OK")
</pallas_src>

<mosaic_0001>
module attributes {stable_mosaic.version = 11 : i64} {
  func.func @_fused_kernel(%arg0: i32, %arg1: memref<8x128xbf16, #tpu.memory_space<vmem>>, %arg2: memref<128x128xbf16, #tpu.memory_space<vmem>>, %arg3: memref<1x128xf32, #tpu.memory_space<vmem>>, %arg4: memref<1x128xf32, #tpu.memory_space<vmem>>, %arg5: memref<1x128xf32, #tpu.memory_space<vmem>>, %arg6: memref<128x128xbf16, #tpu.memory_space<vmem>>, %arg7: memref<1x128xf32, #tpu.memory_space<vmem>>, %arg8: memref<8x128xf32, #tpu.memory_space<vmem>>) attributes {dimension_semantics = [#tpu.dimension_semantics<arbitrary>], iteration_bounds = array<i64: 1>, scalar_prefetch = 0 : i64, scratch_operands = 0 : i64, tpu.core_type = #tpu.core_type<tc>, window_params = [{pipeline_mode = #tpu.pipeline_mode<synchronous>, transform_indices = @transform_0, window_bounds = array<i64: 8, 128>}, {transform_indices = @transform_1, window_bounds = array<i64: 128, 128>}, {transform_indices = @transform_2, window_bounds = array<i64: 1, 128>}, {transform_indices = @transform_3, window_bounds = array<i64: 1, 128>}, {transform_indices = @transform_4, window_bounds = array<i64: 1, 128>}, {transform_indices = @transform_5, window_bounds = array<i64: 128, 128>}, {pipeline_mode = #tpu.pipeline_mode<synchronous>, transform_indices = @transform_6, window_bounds = array<i64: 1, 128>}, {pipeline_mode = #tpu.pipeline_mode<synchronous>, transform_indices = @transform_7, window_bounds = array<i64: 8, 128>}]} {
    %c0 = arith.constant 0 : index
    %c0_0 = arith.constant 0 : index
    %0 = vector.load %arg1[%c0, %c0_0] : memref<8x128xbf16, #tpu.memory_space<vmem>>, vector<8x128xbf16>
    %c0_1 = arith.constant 0 : index
    %c0_2 = arith.constant 0 : index
    %1 = vector.load %arg2[%c0_1, %c0_2] : memref<128x128xbf16, #tpu.memory_space<vmem>>, vector<128x128xbf16>
    %cst = arith.constant dense<0.000000e+00> : vector<8x128xf32>
    %2 = tpu.matmul %0, %1, %cst {dimension_numbers = #tpu.dot_dimension_numbers<[1], [0], [0], [1], [0, 0, 1, 1], [], []>} : vector<8x128xbf16>, vector<128x128xbf16>, vector<8x128xf32> -> vector<8x128xf32>
    %c0_3 = arith.constant 0 : index
    %c0_4 = arith.constant 0 : index
    %3 = vector.load %arg3[%c0_3, %c0_4] : memref<1x128xf32, #tpu.memory_space<vmem>>, vector<1x128xf32>
    %4 = vector.broadcast %3 : vector<1x128xf32> to vector<8x128xf32>
    %5 = arith.addf %2, %4 : vector<8x128xf32>
    %cst_5 = arith.constant dense<0.000000e+00> : vector<128xf32>
    %6 = vector.multi_reduction <add>, %5, %cst_5 [0] : vector<8x128xf32> to vector<128xf32>
    %7 = vector.shape_cast %6 : vector<128xf32> to vector<1x128xf32>
    %cst_6 = arith.constant 1.250000e-01 : f32
    %8 = vector.broadcast %cst_6 : f32 to vector<1x128xf32>
    %9 = arith.mulf %7, %8 : vector<1x128xf32>
    %10 = vector.broadcast %9 : vector<1x128xf32> to vector<8x128xf32>
    %11 = arith.subf %5, %10 : vector<8x128xf32>
    %12 = arith.mulf %11, %11 : vector<8x128xf32>
    %cst_7 = arith.constant dense<0.000000e+00> : vector<128xf32>
    %13 = vector.multi_reduction <add>, %12, %cst_7 [0] : vector<8x128xf32> to vector<128xf32>
    %14 = vector.shape_cast %13 : vector<128xf32> to vector<1x128xf32>
    %cst_8 = arith.constant 1.250000e-01 : f32
    %15 = vector.broadcast %cst_8 : f32 to vector<1x128xf32>
    %16 = arith.mulf %14, %15 : vector<1x128xf32>
    %cst_9 = arith.constant 9.99999974E-6 : f32
    %17 = vector.broadcast %cst_9 : f32 to vector<1x128xf32>
    %18 = arith.addf %16, %17 : vector<1x128xf32>
    %19 = math.rsqrt %18 : vector<1x128xf32>
    %c0_10 = arith.constant 0 : index
    %c0_11 = arith.constant 0 : index
    %20 = vector.load %arg4[%c0_10, %c0_11] : memref<1x128xf32, #tpu.memory_space<vmem>>, vector<1x128xf32>
    %21 = arith.mulf %19, %20 : vector<1x128xf32>
    %22 = vector.broadcast %21 : vector<1x128xf32> to vector<8x128xf32>
    %23 = arith.mulf %11, %22 : vector<8x128xf32>
    %c0_12 = arith.constant 0 : index
    %c0_13 = arith.constant 0 : index
    %24 = vector.load %arg5[%c0_12, %c0_13] : memref<1x128xf32, #tpu.memory_space<vmem>>, vector<1x128xf32>
    %25 = vector.broadcast %24 : vector<1x128xf32> to vector<8x128xf32>
    %26 = arith.addf %23, %25 : vector<8x128xf32>
    %cst_14 = arith.constant 5.000000e-01 : f32
    %27 = vector.broadcast %cst_14 : f32 to vector<8x128xf32>
    %28 = arith.mulf %27, %26 : vector<8x128xf32>
    %cst_15 = arith.constant 0.707106769 : f32
    %29 = vector.broadcast %cst_15 : f32 to vector<8x128xf32>
    %30 = arith.mulf %26, %29 : vector<8x128xf32>
    %31 = math.erf %30 : vector<8x128xf32>
    %cst_16 = arith.constant 1.000000e+00 : f32
    %32 = vector.broadcast %cst_16 : f32 to vector<8x128xf32>
    %33 = arith.addf %32, %31 : vector<8x128xf32>
    %34 = arith.mulf %28, %33 : vector<8x128xf32>
    %35 = arith.truncf %34 : vector<8x128xf32> to vector<8x128xbf16>
    %c0_17 = arith.constant 0 : index
    %c0_18 = arith.constant 0 : index
    %36 = vector.load %arg6[%c0_17, %c0_18] : memref<128x128xbf16, #tpu.memory_space<vmem>>, vector<128x128xbf16>
    %cst_19 = arith.constant dense<0.000000e+00> : vector<8x128xf32>
    %37 = tpu.matmul %35, %36, %cst_19 {dimension_numbers = #tpu.dot_dimension_numbers<[1], [0], [0], [1], [0, 0, 1, 1], [], []>} : vector<8x128xbf16>, vector<128x128xbf16>, vector<8x128xf32> -> vector<8x128xf32>
    %c0_i32 = arith.constant 0 : i32
    %38 = arith.cmpi eq, %arg0, %c0_i32 : i32
    %39 = arith.extui %38 : i1 to i32
    %c0_i32_20 = arith.constant 0 : i32
    %40 = arith.cmpi ne, %39, %c0_i32_20 : i32
    scf.if %40 {
      %c0_25 = arith.constant 0 : index
      %c0_26 = arith.constant 0 : index
      %44 = vector.load %arg7[%c0_25, %c0_26] : memref<1x128xf32, #tpu.memory_space<vmem>>, vector<1x128xf32>
      %45 = vector.shape_cast %44 : vector<1x128xf32> to vector<1x128xf32>
      %46 = vector.broadcast %45 : vector<1x128xf32> to vector<8x128xf32>
      %c0_27 = arith.constant 0 : index
      %c0_28 = arith.constant 0 : index
      %47 = vector.load %arg8[%c0_27, %c0_28] : memref<8x128xf32, #tpu.memory_space<vmem>>, vector<8x128xf32>
      tpu.vector_store %arg8[%c0_27, %c0_28], %46 {strides = array<i32>} : memref<8x128xf32, #tpu.memory_space<vmem>>, vector<8x128xf32>,
    } else {
    }
    %c0_21 = arith.constant 0 : index
    %c0_22 = arith.constant 0 : index
    %41 = vector.load %arg8[%c0_21, %c0_22] : memref<8x128xf32, #tpu.memory_space<vmem>>, vector<8x128xf32>
    %42 = arith.addf %41, %37 : vector<8x128xf32>
    %c0_23 = arith.constant 0 : index
    %c0_24 = arith.constant 0 : index
    %43 = vector.load %arg8[%c0_23, %c0_24] : memref<8x128xf32, #tpu.memory_space<vmem>>, vector<8x128xf32>
    tpu.vector_store %arg8[%c0_23, %c0_24], %42 {strides = array<i32>} : memref<8x128xf32, #tpu.memory_space<vmem>>, vector<8x128xf32>,
    return
  }
  func.func @transform_0(%arg0: i32) -> (i32, i32) {
    %c0_i32 = arith.constant 0 : i32
    %c0_i32_0 = arith.constant 0 : i32
    %c0_i32_1 = arith.constant 0 : i32
    return %c0_i32, %c0_i32_0 : i32, i32
  }
  func.func @transform_1(%arg0: i32) -> (i32, i32) {
    %c0_i32 = arith.constant 0 : i32
    %c0_i32_0 = arith.constant 0 : i32
    return %c0_i32, %arg0 : i32, i32
  }
  func.func @transform_2(%arg0: i32) -> (i32, i32) {
    %c0_i32 = arith.constant 0 : i32
    %c0_i32_0 = arith.constant 0 : i32
    return %c0_i32, %arg0 : i32, i32
  }
  func.func @transform_3(%arg0: i32) -> (i32, i32) {
    %c0_i32 = arith.constant 0 : i32
    %c0_i32_0 = arith.constant 0 : i32
    return %c0_i32, %arg0 : i32, i32
  }
  func.func @transform_4(%arg0: i32) -> (i32, i32) {
    %c0_i32 = arith.constant 0 : i32
    %c0_i32_0 = arith.constant 0 : i32
    return %c0_i32, %arg0 : i32, i32
  }
  func.func @transform_5(%arg0: i32) -> (i32, i32) {
    %c0_i32 = arith.constant 0 : i32
    %c0_i32_0 = arith.constant 0 : i32
    return %arg0, %c0_i32 : i32, i32
  }
  func.func @transform_6(%arg0: i32) -> (i32, i32) {
    %c0_i32 = arith.constant 0 : i32
    %c0_i32_0 = arith.constant 0 : i32
    %c0_i32_1 = arith.constant 0 : i32
    return %c0_i32, %c0_i32_0 : i32, i32
  }
  func.func @transform_7(%arg0: i32) -> (i32, i32) {
    %c0_i32 = arith.constant 0 : i32
    %c0_i32_0 = arith.constant 0 : i32
    %c0_i32_1 = arith.constant 0 : i32
    return %c0_i32, %c0_i32_0 : i32, i32
  }
}

</mosaic_0001>

<bundles_post_ra>
// kernel: mlp_forward.1
= control target key start
LH: loop header
LB: loop body
LE: loop exit
PB: predicated region body
PF: predicated region fallthrough
CT: control target
= control target key end

     0   :  { %s517_s0 = inlined_call_operand.vmem [shape: bf16[8,128], index: 0, kind: input, shape index: {}]   ;;  %s518_s1 = inlined_call_operand.vmem [shape: bf16[128,128], index: 1, kind: input, shape index: {}]   ;;  %s519_s2 = inlined_call_operand.vmem [shape: f32[1,128], index: 2, kind: input, shape index: {}]   ;;  %s520_s3 = inlined_call_operand.vmem [shape: f32[1,128], index: 3, kind: input, shape index: {}]   ;;  %s521_s4 = inlined_call_operand.vmem [shape: f32[1,128], index: 4, kind: input, shape index: {}]   ;;  %s522_s5 = inlined_call_operand.vmem [shape: bf16[128,128], index: 5, kind: input, shape index: {}]   ;;  %s523_s6 = inlined_call_operand.vmem [shape: f32[1,128], index: 6, kind: input, shape index: {}]   ;;  %s524_s7 = inlined_call_operand.hbm [shape: f32[8,128], index: 7, kind: output, shape index: {}]  }
   0x1   :  { %v367_v0 = vld [vmem:[%s518_s1 + $0x38] sm:$0xff]  ;;  %v366_v1 = vld [vmem:[%s518_s1 + $0x30] sm:$0xff] }
   0x2   :  { %96 = vmatpush.bf16.msra.mxu0 %v367_v0 }
   0x3   :  { %12 = vsyncpa [#allocation3], 0  ;;  %v365_v2 = vld [vmem:[%s518_s1 + $0x28] sm:$0xff]  ;;  %v364_v3 = vld [vmem:[%s518_s1 + $0x20] sm:$0xff]  ;;  %s286_s18 = sshll.u32 %s524_s7, 4  ;;  %s287_s18 = int_to_ptr.hbm [resolvable:$true] %s286_s18 }
   0x4   :  { %v363_v4 = vld [vmem:[%s518_s1 + $0x18] sm:$0xff]  ;;  %v362_v5 = vld [vmem:[%s518_s1 + $0x10] sm:$0xff]  ;;  %v361_v6 = vld [vmem:[%s518_s1 + $0x8] sm:$0xff] }
   0x5   :  { %v360_v7 = vld [vmem:[%s518_s1] sm:$0xff]  ;;  %v375_v26 = vld [vmem:[%s522_s5 + $0x38] sm:$0xff]  ;;  %v374_v28 = vld [vmem:[%s522_s5 + $0x30] sm:$0xff] }
   0x6   :  { %97 = vmatpush.bf16.msra.mxu0 %v366_v1  ;;  %v27_v8 = vld [vmem:[%s517_s0] sm:$0xf]  ;;  %254 = vmatpush.bf16.msra.mxu1 %v375_v26  ;;  %v373_v31 = vld [vmem:[%s522_s5 + $0x28] sm:$0xff]  ;;  %v371_v34 = vld [vmem:[%s522_s5 + $0x18] sm:$0xff] }
   0x7   :  { %v377_v9 = vld [vmem:[%s519_s2] ss:$0 sm:$0xff]  ;;  %v370_v37 = vld [vmem:[%s522_s5 + $0x10] sm:$0xff]  ;;  %v369_v40 = vld [vmem:[%s522_s5 + $0x8] sm:$0xff] }
   0x8   :  { %v372_v33 = vld [vmem:[%s522_s5 + $0x20] sm:$0xff] }
   0x9   :  { %v136_v43 = vld [vmem:[%s520_s3] sm:$0x1] }
   0xa   :  { %98 = vmatpush.bf16.msra.mxu0 %v365_v2  ;;  %255 = vmatpush.bf16.msra.mxu1 %v374_v28  ;;  %v368_v44 = vld [vmem:[%s522_s5] sm:$0xff]  ;;  %s410_s5 = smov [#allocation2]  }
   0xb   :  { %v378_v48 = vld [vmem:[%s521_s4] ss:$0 sm:$0xff]  ;;  %s284_s15 = sshll.u32 %s410_s5, 4  ;;  %s285_s15 = int_to_ptr.vmem [resolvable:$true] %s284_s15 }
   0xe   :  { %99 = vmatpush.bf16.msra.mxu0 %v364_v3  ;;  %256 = vmatpush.bf16.msra.mxu1 %v373_v31 }
  0x12   :  { %100 = vmatpush.bf16.msra.mxu0 %v363_v4  ;;  %257 = vmatpush.bf16.msra.mxu1 %v372_v33 }
  0x16   :  { %101 = vmatpush.bf16.msra.mxu0 %v362_v5  ;;  %258 = vmatpush.bf16.msra.mxu1 %v371_v34 }
  0x1a   :  { %102 = vmatpush.bf16.msra.mxu0 %v361_v6  ;;  %259 = vmatpush.bf16.msra.mxu1 %v370_v37 }
  0x1e   :  { %103 = vmatpush.bf16.msra.mxu0 %v360_v7  ;;  %260 = vmatpush.bf16.msra.mxu1 %v369_v40 }
  0x21   :  { %104 = vmatmul.bf16.vlgmr.msra.gmra.mxu0 %v27_v8 }
  0x22   :  { %261 = vmatpush.bf16.msra.mxu1 %v368_v44 }
  0x9e   :  { %v105_v10 = vpop.f32.mrf.mxu0 }
  0x9f   :  { %v106_v11 = vadd.f32 %v377_v9, %v105_v10 }
  0xa1   :  { %v109_v12 = vrot.slane %v106_v11, 4 }
  0xa3   :  { %v110_v13 = vadd.f32 %v109_v12, %v106_v11 }
  0xa5   :  { %v111_v14 = vrot.slane %v110_v13, 2 }
  0xa6   :  { %v107_v15 = vpop.f32.mrf.mxu0 }
  0xa7   :  { %v112_v16 = vadd.f32 %v111_v14, %v110_v13 }
  0xa9   :  { %v113_v17 = vrot.slane %v112_v16, 1 }
  0xab   :  { %v114_v18 = vadd.f32 %v113_v17, %v112_v16 }
  0xad   :  { %v115_v19 = vmul.f32 0.125, %v114_v18 }
  0xaf   :  { %v116_v20 = vsub.f32 %v106_v11, %v115_v19 }
  0xb1   :  { %v117_v21 = vmul.f32 %v116_v20, %v116_v20 }
  0xb3   :  { %v118_v22 = vrot.slane %v117_v21, 4 }
  0xb5   :  { %v119_v23 = vadd.f32 %v118_v22, %v117_v21 }
  0xb7   :  { %v120_v24 = vrot.slane %v119_v23, 2 }
  0xb9   :  { %v121_v25 = vadd.f32 %v120_v24, %v119_v23 }
  0xbb   :  { %v122_v27 = vrot.slane %v121_v25, 1 }
  0xbd   :  { %v123_v29 = vadd.f32 %v122_v27, %v121_v25  ;;  %v379_v27 = vld [vmem:[%s523_s6] ss:$0 sm:$0xff] }
  0xbf   :  { %v124_v30 = vmul.f32 0.125, %v123_v29 }
  0xc1   :  { %v125_v32 = vadd.f32 1e-05, %v124_v30 }
  0xc3   :  { %380 = vrsqrt.f32 %v125_v32  ;;  %vm132_vm1 = vweird.f32 %v125_v32 }
  0xc9   :  { %v381_v35 = vpop.eup %380 }
  0xca   :  { %v127_v36 = vmul.f32 %v381_v35, %v125_v32  ;;  %vm133_vm0 = vweird.f32 %v381_v35 }
  0xcb   :  { %vm134_vm2 = vmor %vm132_vm1, %vm133_vm0 }
  0xcc   :  { %v128_v38 = vmul.f32 %v381_v35, %v127_v36 }
  0xce   :  { %v129_v39 = vmul.f32 0.5, %v128_v38 }
  0xd0   :  { %v130_v41 = vsub.f32 1.5, %v129_v39 }
  0xd2   :  { %v131_v42 = vmul.f32 %v381_v35, %v130_v41 }
  0xd4   :  { %v135_v45 = vsel %vm134_vm2, %v381_v35, %v131_v42 }
  0xd5   :  { %v137_v46 = vmul.f32 %v136_v43, %v135_v45 }
  0xd7   :  { %v138_v47 = vperm.slane %v137_v46, 0 }
  0xd9   :  { %v139_v49 = vmul.f32 %v138_v47, %v116_v20 }
  0xdb   :  { %v144_v50 = vadd.f32 %v378_v48, %v139_v49 }
  0xdd   :  { %v146_v51 = vmul.f32 0.70710677, %v144_v50  ;;  %v145_v23 = vmul.f32 0.5, %v144_v50 }
  0xdf   :  { %v147_v52 = vmul.f32 %v146_v51, %v146_v51 }
  0xe1   :  { %v148_v53 = vmin.f32 %v147_v52, 16.0 }
  0xe3   :  { %v149_v54 = vmul.f32 2.1237322e-06, %v148_v53  ;;  %v160_v55 = vmul.f32 3.8918573e-05, %v148_v53 }
  0xe5   :  { %v150_v56 = vadd.f32 0.00028619796, %v149_v54  ;;  %v161_v57 = vadd.f32 0.001143296, %v160_v55 }
  0xe7   :  { %v151_v58 = vmul.f32 %v150_v56, %v148_v53  ;;  %v162_v59 = vmul.f32 %v161_v57, %v148_v53 }
  0xe9   :  { %v163_v60 = vadd.f32 0.014752088, %v162_v59  ;;  %v152_v61 = vadd.f32 0.0036580483, %v151_v58 }
  0xeb   :  { %v164_v62 = vmul.f32 %v163_v60, %v148_v53  ;;  %v153_v0 = vmul.f32 %v152_v61, %v148_v53 }
  0xed   :  { %v165_v63 = vadd.f32 0.112945676, %v164_v62  ;;  %v154_v3 = vadd.f32 0.05243302, %v153_v0 }
  0xef   :  { %v166_v1 = vmul.f32 %v165_v63, %v148_v53  ;;  %v155_v6 = vmul.f32 %v154_v3, %v148_v53 }
  0xf1   :  { %v167_v2 = vadd.f32 0.4994258, %v166_v1  ;;  %v156_v7 = vadd.f32 0.18741608, %v155_v6 }
  0xf3   :  { %v168_v4 = vmul.f32 %v167_v2, %v148_v53  ;;  %v157_v9 = vmul.f32 %v156_v7, %v148_v53 }
  0xf5   :  { %v169_v5 = vadd.f32 1.0, %v168_v4  ;;  %v158_v13 = vadd.f32 1.1283791, %v157_v9 }
  0xf7   :  { %382 = vrcp.f32 %v169_v5  ;;  %v181_v12 = vand.u32 2147483648, %v169_v5  ;;  %v179_v15 = vand.u32 2147483647, %v169_v5  ;;  %vm175_vm4 = vweird.f32 %v169_v5 }
  0xf8   :  { %v159_v18 = vmul.f32 %v158_v13, %v146_v51 }
  0xf9   :  { %v182_v17 = vor.u32 1.1754944e-38, %v181_v12  ;;  %vm180_vm6 = vcmp.eq.f32.partialorder %v179_v15, 8.507059e+37 }
  0xfd   :  { %v383_v8 = vpop.eup %382 }
  0xfe   :  { %v171_v10 = vmul.f32 %v383_v8, %v169_v5  ;;  %vm176_vm3 = vweird.f32 %v383_v8 }
  0xff   :  { %vm177_vm5 = vmor %vm175_vm4, %vm176_vm3 }
 0x100   :  { %v172_v11 = vsub.f32 1.0, %v171_v10 }
 0x102   :  { %v173_v14 = vmul.f32 %v383_v8, %v172_v11 }
 0x104   :  { %v174_v16 = vadd.f32 %v383_v8, %v173_v14 }
 0x106   :  { %v178_v19 = vsel %vm177_vm5, %v383_v8, %v174_v16 }
 0x107   :  { %v183_v20 = vsel %vm180_vm6, %v182_v17, %v178_v19 }
 0x108   :  { %v184_v21 = vmul.f32 %v183_v20, %v159_v18 }
 0x10a   :  { %v327_v22 = vclamps-f32 %v184_v21, 1.0 }
 0x10c   :  { %v187_v24 = vadd.f32 1.0, %v327_v22 }
 0x10e   :  { %v188_v25 = vmul.f32 %v187_v24, %v145_v23 }
 0x110   :  { %v189_v26 = vpack.c.bf16 %v188_v25, %v188_v25 }
 0x112   :  { %262 = vmatmul.bf16.vlgmr.msra.gmra.mxu1 %v189_v26 }
 0x18f   :  { %v263_v28 = vpop.f32.mrf.mxu1 }
 0x190   :  { %v277_v29 = vadd.f32 %v379_v27, %v263_v28 }
 0x192   :  { %278 = vst [vmem:[#allocation2] sm:$0xff] %v277_v29 }
 0x193   :  { %289 = dma.vmem_to_hbm [thread:$0]  %s285_s15, 128, %s287_s18, [#allocation3]  }
 0x197   :  { %v265_v30 = vpop.f32.mrf.mxu1 }
 0x198   :  { %408 = dma.done.wait [#allocation3], 128  }
 0x199   :  { %409 = vsyncadd [#allocation3], 4294967168 }
 0x19a   :  { %294 = vsyncpa [#allocation3], 1 }

</bundles_post_ra>
